<compile_context>
chip_gen: v6e
topology: v6e:2x2x1
jax: 0.10.0
libtpu: 0.0.40
codegen_flags: <defaults>
</compile_context>

<pallas_src>
import functools

import jax
import jax.numpy as jnp
from jax.experimental import pallas as pl
from jax.experimental.pallas import tpu as pltpu

_LANE = 128      # f32 vreg lane width
_SUBLANE = 16    # bf16 packs 2 rows/sublane -> 16-row alignment is safe for all dtypes


def _round_up(x, m):
    return (x + m - 1) // m * m


def _cdiv(a, b):
    return (a + b - 1) // b


# ----------------------------------------------------------------------------
# Kernel: one batch tile of the 3-layer MLP.
# ----------------------------------------------------------------------------
def _actor_kernel(ma_ref, s_ref, w1_ref, b1_ref, w2_ref, b2_ref, w3_ref,
                  b3_ref, o_ref):
    """Matmuls run on the MXU with f32 accumulation; bias/relu/tanh/scale are
    f32 on the VPU/EUP.  ma_ref is a (1,1) f32 scalar in SMEM."""
    mm_dt = w1_ref.dtype
    # ---- layer 1: relu(state @ W1 + b1)  (state cast to matmul dtype here) ----
    s = s_ref[...].astype(mm_dt)
    a = jnp.dot(s, w1_ref[...], preferred_element_type=jnp.float32)
    a = jnp.maximum(a + b1_ref[...], 0.0)
    # ---- layer 2: relu(a @ W2 + b2) ----
    a = jnp.dot(a.astype(mm_dt), w2_ref[...],
                preferred_element_type=jnp.float32)
    a = jnp.maximum(a + b2_ref[...], 0.0)
    # ---- layer 3: max_action * tanh(a @ W3 + b3) ----
    a = jnp.dot(a.astype(mm_dt), w3_ref[...],
                preferred_element_type=jnp.float32)
    o_ref[...] = (ma_ref[0, 0] * jnp.tanh(a + b3_ref[...])).astype(o_ref.dtype)


# ----------------------------------------------------------------------------
# One-time parameter preparation (hoisted out of the per-call hot path).
# ----------------------------------------------------------------------------
def prepare_actor_params(params, matmul_dtype=jnp.bfloat16):
    """Pad + cast the Actor weights once.
      * layer-1 input dim (state_dim): padded only to a 16-row multiple so the
        per-call state pad stays thin.
      * hidden / action dims: padded to 128-lane multiples -> lane-dense MXU
        tiles and an unmasked output store.
    Weights go to `matmul_dtype`; biases stay f32 (added to the f32 acc)."""
    w1, b1 = params["w1"], params["b1"]
    w2, b2 = params["w2"], params["b2"]
    w3, b3 = params["w3"], params["b3"]
    state_dim, h0 = w1.shape
    h1 = w2.shape[1]
    action_dim = w3.shape[1]

    sd_p = _round_up(state_dim, _SUBLANE)
    h0_p = _round_up(h0, _LANE)
    h1_p = _round_up(h1, _LANE)
    ad_p = _round_up(action_dim, _LANE)

    def pad2(x, rows, cols, dt):
        return jnp.pad(x, ((0, rows - x.shape[0]),
                           (0, cols - x.shape[1]))).astype(dt)

    return {
        "w1": pad2(w1, sd_p, h0_p, matmul_dtype),
        "b1": pad2(b1, 1, h0_p, jnp.float32),
        "w2": pad2(w2, h0_p, h1_p, matmul_dtype),
        "b2": pad2(b2, 1, h1_p, jnp.float32),
        "w3": pad2(w3, h1_p, ad_p, matmul_dtype),
        "b3": pad2(b3, 1, ad_p, jnp.float32),
    }


def _choose_block_b(B, target=512, max_single_tile=1024):
    """Single grid step when the whole batch fits one tile (v5e/v6e: the grid
    is a serial loop, so extra steps are pure overhead); otherwise balanced
    ~`target`-row tiles so awkward batch sizes are not over-padded."""
    B_aligned = _round_up(B, _SUBLANE)
    if B_aligned <= max_single_tile:
        return B_aligned
    n_tiles = _cdiv(B, target)
    return _round_up(_cdiv(B, n_tiles), _SUBLANE)


# ----------------------------------------------------------------------------
# Per-call wrapper (jit-friendly; shape logic is static).
# ----------------------------------------------------------------------------
def actor_forward(state, padded_params, max_action, *, action_dim,
                  block_b=None, out_dtype=jnp.float32,
                  batch_semantics="parallel"):
    """state: (B, state_dim) float32.  padded_params: from prepare_actor_params.
    max_action may be a Python float or a traced scalar (goes through SMEM).
    For v7x, pass batch_semantics=pltpu.CORE_PARALLEL and a block_b giving
    >= 2 grid steps to shard batch tiles across both TensorCores."""
    B, state_dim = state.shape
    w1p, b1p = padded_params["w1"], padded_params["b1"]
    w2p, b2p = padded_params["w2"], padded_params["b2"]
    w3p, b3p = padded_params["w3"], padded_params["b3"]
    sd_p, h0_p = w1p.shape
    h1_p = w2p.shape[1]
    ad_p = w3p.shape[1]

    if block_b is None:
        block_b = _choose_block_b(B)
    block_b = _round_up(block_b, _SUBLANE)
    B_p = _round_up(max(B, block_b), block_b)
    grid = (B_p // block_b,)

    # Single fused pad of the f32 state (no host-side cast; K only to 16-mult).
    if (B_p, sd_p) != (B, state_dim):
        s_p = jnp.pad(state, ((0, B_p - B), (0, sd_p - state_dim)))
    else:
        s_p = state

    ma = jnp.asarray(max_action, jnp.float32).reshape(1, 1)

    # Advisory cost: kernel is overhead/memory-bound at these shapes.
    flops = 2 * B_p * (sd_p * h0_p + h0_p * h1_p + h1_p * ad_p)
    bytes_accessed = int(
        B_p * sd_p * 4
        + sum(int(x.size) * x.dtype.itemsize
              for x in (w1p, b1p, w2p, b2p, w3p, b3p))
        + B_p * ad_p * jnp.dtype(out_dtype).itemsize)
    cost = pl.CostEstimate(flops=int(flops),
                           transcendentals=int(B_p * ad_p),
                           bytes_accessed=bytes_accessed)

    out_p = pl.pallas_call(
        _actor_kernel,
        out_shape=jax.ShapeDtypeStruct((B_p, ad_p), out_dtype),
        grid_spec=pltpu.PrefetchScalarGridSpec(
            num_scalar_prefetch=0,
            grid=grid,
            in_specs=[
                # max_action scalar lives in SMEM (no recompile per value)
                pl.BlockSpec(memory_space=pltpu.MemorySpace.SMEM),
                # state: tiled along batch, feature dim = full (thin) array dim
                pl.BlockSpec((block_b, sd_p), lambda i: (i, 0)),
                # weights / biases: full arrays, constant index_map
                # (fetched once, never re-DMA'd across grid steps)
                pl.BlockSpec((sd_p, h0_p), lambda i: (0, 0)),
                pl.BlockSpec((1, h0_p), lambda i: (0, 0)),
                pl.BlockSpec((h0_p, h1_p), lambda i: (0, 0)),
                pl.BlockSpec((1, h1_p), lambda i: (0, 0)),
                pl.BlockSpec((h1_p, ad_p), lambda i: (0, 0)),
                pl.BlockSpec((1, ad_p), lambda i: (0, 0)),
            ],
            # lane-dense output block (last dim is a multiple of 128)
            out_specs=pl.BlockSpec((block_b, ad_p), lambda i: (i, 0)),
        ),
        compiler_params=pltpu.CompilerParams(
            dimension_semantics=(batch_semantics,)),
        cost_estimate=cost,
    )(ma, s_p, w1p, b1p, w2p, b2p, w3p, b3p)

    # strip batch / lane padding (padded rows hold tanh(bias) garbage)
    return out_p[:B, :action_dim]


# ----------------------------------------------------------------------------
# Init + pure-JAX reference
# ----------------------------------------------------------------------------
def init_actor_params(key, state_dim, action_dim, hidden_sizes):
    """Synthetic init matching nn.Linear's U(-1/sqrt(fan_in), ...). Weights are
    built in PyTorch's (out, in) shape then transposed to (in, out)."""
    h0, h1 = hidden_sizes
    ks = jax.random.split(key, 6)

    def linear(kw, kb, in_f, out_f):
        bound = 1.0 / jnp.sqrt(in_f)
        w = jax.random.uniform(kw, (out_f, in_f), jnp.float32, -bound, bound)
        b = jax.random.uniform(kb, (out_f,), jnp.float32, -bound, bound)
        return w.T, b.reshape(1, out_f)

    w1, b1 = linear(ks[0], ks[1], state_dim, h0)
    w2, b2 = linear(ks[2], ks[3], h0, h1)
    w3, b3 = linear(ks[4], ks[5], h1, action_dim)
    return {"w1": w1, "b1": b1, "w2": w2, "b2": b2, "w3": w3, "b3": b3}


def actor_reference(state, params, max_action, matmul_dtype=jnp.float32):
    """Pure-JAX reference with the same dtype policy as the kernel."""
    dt = matmul_dtype
    a = jnp.dot(state.astype(dt), params["w1"].astype(dt),
                preferred_element_type=jnp.float32)
    a = jax.nn.relu(a + params["b1"])
    a = jnp.dot(a.astype(dt), params["w2"].astype(dt),
                preferred_element_type=jnp.float32)
    a = jax.nn.relu(a + params["b2"])
    a = jnp.dot(a.astype(dt), params["w3"].astype(dt),
                preferred_element_type=jnp.float32)
    return max_action * jnp.tanh(a + params["b3"])


if __name__ == "__main__":
    key = jax.random.PRNGKey(0)
    k_params, k_state = jax.random.split(key)

    # Small shapes consistent with the Actor module (exercise padding on
    # every dim: state 24->32, hidden 64/48->128, action 4->128).
    batch = 64
    state_dim = 24
    action_dim = 4
    hidden_sizes = [64, 48]
    max_action = 2.0

    params = init_actor_params(k_params, state_dim, action_dim, hidden_sizes)
    state = jax.random.normal(k_state, (batch, state_dim), jnp.float32)

    ref_f32 = actor_reference(state, params, max_action,
                              matmul_dtype=jnp.float32)
    ref_bf16 = actor_reference(state, params, max_action,
                               matmul_dtype=jnp.bfloat16)

    # --- bf16-operand fast path (weights prepared ONCE, single grid step) ---
    padded_bf16 = prepare_actor_params(params, matmul_dtype=jnp.bfloat16)
    fwd_bf16 = jax.jit(functools.partial(actor_forward, action_dim=action_dim,
                                         out_dtype=jnp.float32))
    out_bf16 = jax.block_until_ready(fwd_bf16(state, padded_bf16, max_action))
    assert out_bf16.shape == (batch, action_dim)
    assert jnp.allclose(out_bf16, ref_bf16, atol=2e-3 * max_action,
                        rtol=2e-3), "bf16 kernel mismatch vs bf16 reference"
    assert jnp.allclose(out_bf16, ref_f32, atol=3e-2 * max_action,
                        rtol=3e-2), "bf16 kernel too far from f32 reference"

    # --- bf16 output variant (halves the dominant output HBM stream) ---
    fwd_bf16o = jax.jit(functools.partial(actor_forward, action_dim=action_dim,
                                          out_dtype=jnp.bfloat16))
    out_bf16o = jax.block_until_ready(fwd_bf16o(state, padded_bf16, max_action))
    assert jnp.allclose(out_bf16o.astype(jnp.float32), ref_f32,
                        atol=4e-2 * max_action, rtol=4e-2), \
        "bf16-output kernel too far from f32 reference"

    # --- f32-operand path (exactness check; block_b=32 exercises a 2-step grid) ---
    padded_f32 = prepare_actor_params(params, matmul_dtype=jnp.float32)
    fwd_f32 = jax.jit(functools.partial(actor_forward, action_dim=action_dim,
                                        block_b=32, out_dtype=jnp.float32))
    out_f32 = jax.block_until_ready(fwd_f32(state, padded_f32, max_action))
    assert jnp.allclose(out_f32, ref_f32, atol=1e-5, rtol=1e-5), \
        "f32 kernel mismatch vs reference"

    print("KERNEL_OK")
</pallas_src>

<mosaic_0001>
module attributes {stable_mosaic.version = 11 : i64} {
  func.func @_actor_kernel(%arg0: i32, %arg1: memref<1x1xf32, #tpu.memory_space<smem>>, %arg2: memref<64x32xf32, #tpu.memory_space<vmem>>, %arg3: memref<32x128xbf16, #tpu.memory_space<vmem>>, %arg4: memref<1x128xf32, #tpu.memory_space<vmem>>, %arg5: memref<128x128xbf16, #tpu.memory_space<vmem>>, %arg6: memref<1x128xf32, #tpu.memory_space<vmem>>, %arg7: memref<128x128xbf16, #tpu.memory_space<vmem>>, %arg8: memref<1x128xf32, #tpu.memory_space<vmem>>, %arg9: memref<64x128xf32, #tpu.memory_space<vmem>>) attributes {dimension_semantics = [#tpu.dimension_semantics<parallel>], iteration_bounds = array<i64: 1>, scalar_prefetch = 0 : i64, scratch_operands = 0 : i64, tpu.core_type = #tpu.core_type<tc>, window_params = [{transform_indices = @transform_0, window_bounds = array<i64: 1, 1>}, {transform_indices = @transform_1, window_bounds = array<i64: 64, 32>}, {pipeline_mode = #tpu.pipeline_mode<synchronous>, transform_indices = @transform_2, window_bounds = array<i64: 32, 128>}, {pipeline_mode = #tpu.pipeline_mode<synchronous>, transform_indices = @transform_3, window_bounds = array<i64: 1, 128>}, {pipeline_mode = #tpu.pipeline_mode<synchronous>, transform_indices = @transform_4, window_bounds = array<i64: 128, 128>}, {pipeline_mode = #tpu.pipeline_mode<synchronous>, transform_indices = @transform_5, window_bounds = array<i64: 1, 128>}, {pipeline_mode = #tpu.pipeline_mode<synchronous>, transform_indices = @transform_6, window_bounds = array<i64: 128, 128>}, {pipeline_mode = #tpu.pipeline_mode<synchronous>, transform_indices = @transform_7, window_bounds = array<i64: 1, 128>}, {transform_indices = @transform_8, window_bounds = array<i64: 64, 128>}]} {
    %c0 = arith.constant 0 : index
    %c0_0 = arith.constant 0 : index
    %0 = vector.load %arg2[%c0, %c0_0] : memref<64x32xf32, #tpu.memory_space<vmem>>, vector<64x32xf32>
    %1 = arith.truncf %0 : vector<64x32xf32> to vector<64x32xbf16>
    %c0_1 = arith.constant 0 : index
    %c0_2 = arith.constant 0 : index
    %2 = vector.load %arg3[%c0_1, %c0_2] : memref<32x128xbf16, #tpu.memory_space<vmem>>, vector<32x128xbf16>
    %cst = arith.constant dense<0.000000e+00> : vector<64x128xf32>
    %3 = tpu.matmul %1, %2, %cst {dimension_numbers = #tpu.dot_dimension_numbers<[1], [0], [0], [1], [0, 0, 1, 1], [], []>} : vector<64x32xbf16>, vector<32x128xbf16>, vector<64x128xf32> -> vector<64x128xf32>
    %c0_3 = arith.constant 0 : index
    %c0_4 = arith.constant 0 : index
    %4 = vector.load %arg4[%c0_3, %c0_4] : memref<1x128xf32, #tpu.memory_space<vmem>>, vector<1x128xf32>
    %5 = vector.broadcast %4 : vector<1x128xf32> to vector<64x128xf32>
    %6 = arith.addf %3, %5 : vector<64x128xf32>
    %cst_5 = arith.constant 0.000000e+00 : f32
    %7 = vector.broadcast %cst_5 : f32 to vector<64x128xf32>
    %8 = arith.maximumf %6, %7 : vector<64x128xf32>
    %9 = arith.truncf %8 : vector<64x128xf32> to vector<64x128xbf16>
    %c0_6 = arith.constant 0 : index
    %c0_7 = arith.constant 0 : index
    %10 = vector.load %arg5[%c0_6, %c0_7] : memref<128x128xbf16, #tpu.memory_space<vmem>>, vector<128x128xbf16>
    %cst_8 = arith.constant dense<0.000000e+00> : vector<64x128xf32>
    %11 = tpu.matmul %9, %10, %cst_8 {dimension_numbers = #tpu.dot_dimension_numbers<[1], [0], [0], [1], [0, 0, 1, 1], [], []>} : vector<64x128xbf16>, vector<128x128xbf16>, vector<64x128xf32> -> vector<64x128xf32>
    %c0_9 = arith.constant 0 : index
    %c0_10 = arith.constant 0 : index
    %12 = vector.load %arg6[%c0_9, %c0_10] : memref<1x128xf32, #tpu.memory_space<vmem>>, vector<1x128xf32>
    %13 = vector.broadcast %12 : vector<1x128xf32> to vector<64x128xf32>
    %14 = arith.addf %11, %13 : vector<64x128xf32>
    %cst_11 = arith.constant 0.000000e+00 : f32
    %15 = vector.broadcast %cst_11 : f32 to vector<64x128xf32>
    %16 = arith.maximumf %14, %15 : vector<64x128xf32>
    %17 = arith.truncf %16 : vector<64x128xf32> to vector<64x128xbf16>
    %c0_12 = arith.constant 0 : index
    %c0_13 = arith.constant 0 : index
    %18 = vector.load %arg7[%c0_12, %c0_13] : memref<128x128xbf16, #tpu.memory_space<vmem>>, vector<128x128xbf16>
    %cst_14 = arith.constant dense<0.000000e+00> : vector<64x128xf32>
    %19 = tpu.matmul %17, %18, %cst_14 {dimension_numbers = #tpu.dot_dimension_numbers<[1], [0], [0], [1], [0, 0, 1, 1], [], []>} : vector<64x128xbf16>, vector<128x128xbf16>, vector<64x128xf32> -> vector<64x128xf32>
    %c0_15 = arith.constant 0 : index
    %c0_16 = arith.constant 0 : index
    %20 = memref.load %arg1[%c0_15, %c0_16] : memref<1x1xf32, #tpu.memory_space<smem>>
    %c0_17 = arith.constant 0 : index
    %c0_18 = arith.constant 0 : index
    %21 = vector.load %arg8[%c0_17, %c0_18] : memref<1x128xf32, #tpu.memory_space<vmem>>, vector<1x128xf32>
    %22 = vector.broadcast %21 : vector<1x128xf32> to vector<64x128xf32>
    %23 = arith.addf %19, %22 : vector<64x128xf32>
    %24 = math.tanh %23 : vector<64x128xf32>
    %25 = vector.broadcast %20 : f32 to vector<64x128xf32>
    %26 = arith.mulf %25, %24 : vector<64x128xf32>
    %c0_19 = arith.constant 0 : index
    %c0_20 = arith.constant 0 : index
    %27 = vector.load %arg9[%c0_19, %c0_20] : memref<64x128xf32, #tpu.memory_space<vmem>>, vector<64x128xf32>
    tpu.vector_store %arg9[%c0_19, %c0_20], %26 {strides = array<i32>} : memref<64x128xf32, #tpu.memory_space<vmem>>, vector<64x128xf32>,
    return
  }
  func.func @transform_0(%arg0: i32) -> (i32, i32) {
    %c0_i32 = arith.constant 0 : i32
    %c0_i32_0 = arith.constant 0 : i32
    %c0_i32_1 = arith.constant 0 : i32
    return %c0_i32, %c0_i32_0 : i32, i32
  }
  func.func @transform_1(%arg0: i32) -> (i32, i32) {
    %c0_i32 = arith.constant 0 : i32
    %c0_i32_0 = arith.constant 0 : i32
    return %arg0, %c0_i32 : i32, i32
  }
  func.func @transform_2(%arg0: i32) -> (i32, i32) {
    %c0_i32 = arith.constant 0 : i32
    %c0_i32_0 = arith.constant 0 : i32
    %c0_i32_1 = arith.constant 0 : i32
    return %c0_i32, %c0_i32_0 : i32, i32
  }
  func.func @transform_3(%arg0: i32) -> (i32, i32) {
    %c0_i32 = arith.constant 0 : i32
    %c0_i32_0 = arith.constant 0 : i32
    %c0_i32_1 = arith.constant 0 : i32
    return %c0_i32, %c0_i32_0 : i32, i32
  }
  func.func @transform_4(%arg0: i32) -> (i32, i32) {
    %c0_i32 = arith.constant 0 : i32
    %c0_i32_0 = arith.constant 0 : i32
    %c0_i32_1 = arith.constant 0 : i32
    return %c0_i32, %c0_i32_0 : i32, i32
  }
  func.func @transform_5(%arg0: i32) -> (i32, i32) {
    %c0_i32 = arith.constant 0 : i32
    %c0_i32_0 = arith.constant 0 : i32
    %c0_i32_1 = arith.constant 0 : i32
    return %c0_i32, %c0_i32_0 : i32, i32
  }
  func.func @transform_6(%arg0: i32) -> (i32, i32) {
    %c0_i32 = arith.constant 0 : i32
    %c0_i32_0 = arith.constant 0 : i32
    %c0_i32_1 = arith.constant 0 : i32
    return %c0_i32, %c0_i32_0 : i32, i32
  }
  func.func @transform_7(%arg0: i32) -> (i32, i32) {
    %c0_i32 = arith.constant 0 : i32
    %c0_i32_0 = arith.constant 0 : i32
    %c0_i32_1 = arith.constant 0 : i32
    return %c0_i32, %c0_i32_0 : i32, i32
  }
  func.func @transform_8(%arg0: i32) -> (i32, i32) {
    %c0_i32 = arith.constant 0 : i32
    %c0_i32_0 = arith.constant 0 : i32
    return %arg0, %c0_i32 : i32, i32
  }
}

</mosaic_0001>

<bundles_post_ra>
// kernel: actor_forward.1
= control target key start
LH: loop header
LB: loop body
LE: loop exit
PB: predicated region body
PF: predicated region fallthrough
CT: control target
= control target key end

     0   :  { %vm66_vm0 = vcmask 261120   ;;  %s782_s2 = inlined_call_operand.vmem [shape: bf16[32,128], index: 2, kind: input, shape index: {}]   ;;  %s783_s1 = inlined_call_operand.vmem [shape: f32[64,32], index: 1, kind: input, shape index: {}]   ;;  %s784_s4 = inlined_call_operand.vmem [shape: bf16[128,128], index: 4, kind: input, shape index: {}]   ;;  %s785_s6 = inlined_call_operand.vmem [shape: bf16[128,128], index: 6, kind: input, shape index: {}]   ;;  %s786_s3 = inlined_call_operand.vmem [shape: f32[1,128], index: 3, kind: input, shape index: {}]   ;;  %s787_s5 = inlined_call_operand.vmem [shape: f32[1,128], index: 5, kind: input, shape index: {}]   ;;  %s788_s7 = inlined_call_operand.vmem [shape: f32[1,128], index: 7, kind: input, shape index: {}]   ;;  %s789_s0 = inlined_call_operand.<no memory space> [shape: f32[1,1], index: 0, kind: input, shape index: {}]   ;;  %s790_s8 = inlined_call_operand.vmem [shape: f32[64,128], index: 8, kind: output, shape index: {}]  }
   0x1   :  { %v585_v0 = vld [vmem:[%s782_s2 + $0x8] sm:$0xff]   ;;  %v586_v1 = vld [vmem:[%s782_s2] sm:$0xff]   ;;  %v33_v5 = vld [vmem:[%s783_s1 + $0x10] sm:$0xff] }
   0x2   :  { %525 = vmatprep.subr.bf16.mxu0 %v585_v0  ;;  %v31_v2 = vld [vmem:[%s783_s1] sm:$0xff]  ;;  %v32_v3 = vld [vmem:[%s783_s1 + $0x8] sm:$0xff]  ;;  %v34_v6 = vld [vmem:[%s783_s1 + $0x18] sm:$0xff] }
   0x3   :  { %526 = vmatpush3.bf16.msra.mxu0 %v585_v0  ;;  %v39_v4 = vpack.c.bf16 %v32_v3, %v31_v2  ;;  %v35_v7 = vld [vmem:[%s783_s1 + $0x20] sm:$0xff]  ;;  %v36_v8 = vld [vmem:[%s783_s1 + $0x28] sm:$0xff]  ;;  %v587_v9 = vld [vmem:[%s784_s4 + $0x38] sm:$0xff]   ;;  %v40_v10 = vpack.c.bf16 %v34_v6, %v33_v5 }
   0x4   :  { %527 = vmatprep.subr.bf16.mxu0 %v586_v1  ;;  %v588_v11 = vld [vmem:[%s784_s4 + $0x30] sm:$0xff]   ;;  %v41_v12 = vpack.c.bf16 %v36_v8, %v35_v7  ;;  %537 = vmatprep.subr.bf16.mxu1 %v587_v9  ;;  %v589_v14 = vld [vmem:[%s784_s4 + $0x28] sm:$0xff]   ;;  %v38_v15 = vld [vmem:[%s783_s1 + $0x38] sm:$0xff] }
   0x5   :  { %529 = vmatprep.mubr.msk.bf16.mxu0 %vm66_vm0, %v39_v4  ;;  %538 = vmatpush3.bf16.msra.mxu1 %v587_v9  ;;  %v37_v13 = vld [vmem:[%s783_s1 + $0x30] sm:$0xff]  ;;  %v590_v16 = vld [vmem:[%s784_s4 + $0x20] sm:$0xff]   ;;  %v591_v18 = vld [vmem:[%s784_s4 + $0x18] sm:$0xff]  }
   0x6   :  { %539 = vmatprep.subr.bf16.mxu1 %v588_v11  ;;  %v42_v17 = vpack.c.bf16 %v38_v15, %v37_v13  ;;  %v592_v19 = vld [vmem:[%s784_s4 + $0x10] sm:$0xff]   ;;  %v593_v20 = vld [vmem:[%s784_s4 + $0x8] sm:$0xff]   ;;  %v594_v21 = vld [vmem:[%s784_s4] sm:$0xff]  }
   0x7   :  { %528 = vmatpush3.bf16.msra.mxu0 %v586_v1  ;;  %v595_v22 = vld [vmem:[%s785_s6 + $0x38] sm:$0xff]   ;;  %v596_v23 = vld [vmem:[%s785_s6 + $0x30] sm:$0xff]   ;;  %v597_v24 = vld [vmem:[%s785_s6 + $0x28] sm:$0xff]  }
   0x8   :  { %561 = vmatprep.subr.bf16.mxu0 %v595_v22  ;;  %v598_v25 = vld [vmem:[%s785_s6 + $0x20] sm:$0xff]   ;;  %v599_v26 = vld [vmem:[%s785_s6 + $0x18] sm:$0xff]   ;;  %v600_v56 = vld [vmem:[%s785_s6 + $0x10] sm:$0xff]  }
   0x9   :  { %540 = vmatpush3.bf16.msra.mxu1 %v588_v11  ;;  %v470_v29 = vld [vmem:[%s786_s3] ss:$0 sm:$0xff]  ;;  %v601_v57 = vld [vmem:[%s785_s6 + $0x8] sm:$0xff]  }
   0xa   :  { %530 = vmatmul.mubr.msk.bf16.vlgmr.msra.gmra.mxu0 %vm66_vm0, %v40_v10  ;;  %541 = vmatprep.subr.bf16.mxu1 %v589_v14  ;;  %v602_v58 = vld [vmem:[%s785_s6] sm:$0xff]  }
   0xb   :  { %533 = vmatprep.mubr.msk.bf16.mxu0 %vm66_vm0, %v41_v12  ;;  %562 = vmatpush3.bf16.msra.mxu0 %v595_v22  ;;  %v477_v61 = vld [vmem:[%s787_s5] ss:$0 sm:$0xff] }
   0xc   :  { %563 = vmatprep.subr.bf16.mxu0 %v596_v23 }
   0xd   :  { %542 = vmatpush3.bf16.msra.mxu1 %v589_v14 }
   0xe   :  { %543 = vmatprep.subr.bf16.mxu1 %v590_v16 }
   0xf   :  { %564 = vmatpush3.bf16.msra.mxu0 %v596_v23 }
  0x10   :  { %565 = vmatprep.subr.bf16.mxu0 %v597_v24 }
  0x11   :  { %544 = vmatpush3.bf16.msra.mxu1 %v590_v16 }
  0x12   :  { %534 = vmatmul.mubr.msk.bf16.gmra.mxu0 %vm66_vm0, %v42_v17  ;;  %545 = vmatprep.subr.bf16.mxu1 %v591_v18 }
  0x13   :  { %566 = vmatpush3.bf16.msra.mxu0 %v597_v24  ;;  %v486_v24 = vld [vmem:[%s788_s7] ss:$0 sm:$0xff] }
  0x14   :  { %567 = vmatprep.subr.bf16.mxu0 %v598_v25 }
  0x15   :  { %546 = vmatpush3.bf16.msra.mxu1 %v591_v18 }
  0x16   :  { %547 = vmatprep.subr.bf16.mxu1 %v592_v19 }
  0x17   :  { %568 = vmatpush3.bf16.msra.mxu0 %v598_v25 }
  0x18   :  { %569 = vmatprep.subr.bf16.mxu0 %v599_v26 }
  0x19   :  { %548 = vmatpush3.bf16.msra.mxu1 %v592_v19 }
  0x1a   :  { %549 = vmatprep.subr.bf16.mxu1 %v593_v20 }
  0x1b   :  { %570 = vmatpush3.bf16.msra.mxu0 %v599_v26 }
  0x1c   :  { %571 = vmatprep.subr.bf16.mxu0 %v600_v56 }
  0x1d   :  { %550 = vmatpush3.bf16.msra.mxu1 %v593_v20 }
  0x1e   :  { %551 = vmatprep.subr.bf16.mxu1 %v594_v21 }
  0x1f   :  { %572 = vmatpush3.bf16.msra.mxu0 %v600_v56 }
  0x20   :  { %573 = vmatprep.subr.bf16.mxu0 %v601_v57 }
  0x21   :  { %552 = vmatpush3.bf16.msra.mxu1 %v594_v21 }
  0x23   :  { %574 = vmatpush3.bf16.msra.mxu0 %v601_v57 }
  0x24   :  { %575 = vmatprep.subr.bf16.mxu0 %v602_v58 }
  0x27   :  { %576 = vmatpush3.bf16.msra.mxu0 %v602_v58 }
  0xca   :  { %v531_v27 = vpop.f32.mrf.mxu0 }
  0xcb   :  { %v122_v33 = vadd.f32 %v531_v27, %v470_v29 }
  0xcc   :  { %v113_v28 = vpop.f32.mrf.mxu0 }
  0xcd   :  { %v114_v31 = vadd.f32 %v470_v29, %v113_v28  ;;  %v146_v40 = vmax.f32 %v122_v33, 0.0 }
  0xce   :  { %v532_v30 = vpop.f32.mrf.mxu0 }
  0xcf   :  { %v125_v32 = vadd.f32 %v532_v30, %v470_v29  ;;  %v144_v38 = vmax.f32 %v114_v31, 0.0 }
  0xd0   :  { %v116_v34 = vpop.f32.mrf.mxu0 }
  0xd1   :  { %v117_v35 = vadd.f32 %v470_v29, %v116_v34  ;;  %v147_v36 = vmax.f32 %v125_v32, 0.0 }
  0xd2   :  { %v535_v37 = vpop.f32.mrf.mxu0 }
  0xd3   :  { %v145_v39 = vmax.f32 %v117_v35, 0.0  ;;  %v153_v43 = vpack.c.bf16 %v147_v36, %v146_v40  ;;  %v138_v47 = vadd.f32 %v535_v37, %v470_v29 }
  0xd4   :  { %v129_v41 = vpop.f32.mrf.mxu0 }
  0xd5   :  { %v152_v42 = vpack.c.bf16 %v145_v39, %v144_v38  ;;  %v130_v45 = vadd.f32 %v470_v29, %v129_v41  ;;  %v150_v53 = vmax.f32 %v138_v47, 0.0  ;;  %v449_v39 = vstv %s789_s0 }
  0xd6   :  { %v536_v44 = vpop.f32.mrf.mxu0 }
  0xd7   :  { %v141_v46 = vadd.f32 %v536_v44, %v470_v29  ;;  %553 = vmatprep.mubr.bf16.mxu1 %v152_v42  ;;  %v148_v51 = vmax.f32 %v130_v45, 0.0 }
  0xd8   :  { %v132_v48 = vpop.f32.mrf.mxu0  ;;  %554 = vmatmul.mubr.bf16.vlgmr.msra.gmra.mxu1 %v153_v43 }
  0xd9   :  { %v133_v49 = vadd.f32 %v470_v29, %v132_v48  ;;  %v151_v50 = vmax.f32 %v141_v46, 0.0 }
  0xdb   :  { %v149_v52 = vmax.f32 %v133_v49, 0.0  ;;  %v155_v55 = vpack.c.bf16 %v151_v50, %v150_v53 }
  0xdd   :  { %v154_v54 = vpack.c.bf16 %v149_v52, %v148_v51 }
  0xdf   :  { %557 = vmatprep.mubr.bf16.mxu1 %v154_v54 }
  0xe0   :  { %558 = vmatmul.mubr.bf16.gmra.mxu1 %v155_v55 }
 0x198   :  { %v555_v59 = vpop.f32.mrf.mxu1 }
 0x199   :  { %v270_v1 = vadd.f32 %v555_v59, %v477_v61 }
 0x19a   :  { %v261_v60 = vpop.f32.mrf.mxu1 }
 0x19b   :  { %v262_v63 = vadd.f32 %v477_v61, %v261_v60  ;;  %v294_v8 = vmax.f32 %v270_v1, 0.0 }
 0x19c   :  { %v556_v62 = vpop.f32.mrf.mxu1 }
 0x19d   :  { %v273_v0 = vadd.f32 %v556_v62, %v477_v61  ;;  %v292_v6 = vmax.f32 %v262_v63, 0.0 }
 0x19e   :  { %v264_v2 = vpop.f32.mrf.mxu1 }
 0x19f   :  { %v265_v3 = vadd.f32 %v477_v61, %v264_v2  ;;  %v295_v4 = vmax.f32 %v273_v0, 0.0 }
 0x1a0   :  { %v559_v5 = vpop.f32.mrf.mxu1 }
 0x1a1   :  { %v293_v7 = vmax.f32 %v265_v3, 0.0  ;;  %v301_v11 = vpack.c.bf16 %v295_v4, %v294_v8  ;;  %v286_v15 = vadd.f32 %v559_v5, %v477_v61 }
 0x1a2   :  { %v277_v9 = vpop.f32.mrf.mxu1 }
 0x1a3   :  { %v300_v10 = vpack.c.bf16 %v293_v7, %v292_v6  ;;  %v278_v13 = vadd.f32 %v477_v61, %v277_v9  ;;  %v298_v21 = vmax.f32 %v286_v15, 0.0 }
 0x1a4   :  { %v560_v12 = vpop.f32.mrf.mxu1 }
 0x1a5   :  { %v289_v14 = vadd.f32 %v560_v12, %v477_v61  ;;  %577 = vmatprep.mubr.bf16.mxu0 %v300_v10  ;;  %v296_v19 = vmax.f32 %v278_v13, 0.0 }
 0x1a6   :  { %v280_v16 = vpop.f32.mrf.mxu1  ;;  %578 = vmatmul.mubr.bf16.vlgmr.msra.gmra.mxu0 %v301_v11 }
 0x1a7   :  { %v281_v17 = vadd.f32 %v477_v61, %v280_v16  ;;  %v299_v18 = vmax.f32 %v289_v14, 0.0 }
 0x1a9   :  { %v297_v20 = vmax.f32 %v281_v17, 0.0  ;;  %v303_v23 = vpack.c.bf16 %v299_v18, %v298_v21 }
 0x1ab   :  { %v302_v22 = vpack.c.bf16 %v297_v20, %v296_v19 }
 0x1ad   :  { %581 = vmatprep.mubr.bf16.mxu0 %v302_v22 }
 0x1ae   :  { %582 = vmatmul.mubr.bf16.gmra.mxu0 %v303_v23 }
 0x266   :  { %v579_v25 = vpop.f32.mrf.mxu0 }
 0x267   :  { %v419_v26 = vadd.f32 %v579_v25, %v486_v24 }
 0x268   :  { %v410_v27 = vpop.f32.mrf.mxu0 }
 0x269   :  { %603 = vtanh.f32 %v419_v26  ;;  %v411_v28 = vadd.f32 %v486_v24, %v410_v27 }
 0x26a   :  { %v580_v29 = vpop.f32.mrf.mxu0 }
 0x26b   :  { %605 = vtanh.f32 %v411_v28  ;;  %v422_v30 = vadd.f32 %v580_v29, %v486_v24 }
 0x26c   :  { %v413_v31 = vpop.f32.mrf.mxu0 }
 0x26d   :  { %607 = vtanh.f32 %v422_v30  ;;  %v414_v32 = vadd.f32 %v486_v24, %v413_v31 }
 0x26e   :  { %v583_v33 = vpop.f32.mrf.mxu0 }
 0x26f   :  { %609 = vtanh.f32 %v414_v32  ;;  %v435_v34 = vadd.f32 %v583_v33, %v486_v24 }
 0x270   :  { %v426_v35 = vpop.f32.mrf.mxu0 }
 0x271   :  { %611 = vtanh.f32 %v435_v34  ;;  %v427_v36 = vadd.f32 %v486_v24, %v426_v35 }
 0x272   :  { %v584_v37 = vpop.f32.mrf.mxu0 }
 0x273   :  { %613 = vtanh.f32 %v427_v36  ;;  %v438_v38 = vadd.f32 %v584_v37, %v486_v24 }
 0x274   :  { %v429_v40 = vpop.f32.mrf.mxu0 }
 0x275   :  { %615 = vtanh.f32 %v438_v38  ;;  %v430_v41 = vadd.f32 %v486_v24, %v429_v40 }
 0x276   :  { %v604_v42 = vpop.eup %603 }
 0x277   :  { %v452_v43 = vmul.f32 %v604_v42, %v449_v39  ;;  %617 = vtanh.f32 %v430_v41 }
 0x278   :  { %v606_v44 = vpop.eup %605 }
 0x279   :  { %460 = vst [vmem:[%s790_s8 + $0x10] sm:$0xff] %v452_v43  ;;  %v450_v45 = vmul.f32 %v606_v44, %v449_v39 }
 0x27a   :  { %v608_v46 = vpop.eup %607 }
 0x27b   :  { %458 = vst [vmem:[%s790_s8] sm:$0xff] %v450_v45  ;;  %v453_v47 = vmul.f32 %v608_v46, %v449_v39 }
 0x27c   :  { %v610_v48 = vpop.eup %609 }
 0x27d   :  { %461 = vst [vmem:[%s790_s8 + $0x18] sm:$0xff] %v453_v47  ;;  %v451_v49 = vmul.f32 %v610_v48, %v449_v39 }
 0x27e   :  { %v612_v50 = vpop.eup %611 }
 0x27f   :  { %459 = vst [vmem:[%s790_s8 + $0x8] sm:$0xff] %v451_v49  ;;  %v456_v51 = vmul.f32 %v612_v50, %v449_v39 }
 0x280   :  { %v614_v52 = vpop.eup %613 }
 0x281   :  { %464 = vst [vmem:[%s790_s8 + $0x30] sm:$0xff] %v456_v51  ;;  %v454_v53 = vmul.f32 %v614_v52, %v449_v39 }
 0x282   :  { %v616_v54 = vpop.eup %615 }
 0x283   :  { %462 = vst [vmem:[%s790_s8 + $0x20] sm:$0xff] %v454_v53  ;;  %v457_v55 = vmul.f32 %v616_v54, %v449_v39 }
 0x284   :  { %v618_v56 = vpop.eup %617 }
 0x285   :  { %465 = vst [vmem:[%s790_s8 + $0x38] sm:$0xff] %v457_v55  ;;  %v455_v57 = vmul.f32 %v618_v56, %v449_v39 }
 0x287   :  { %463 = vst [vmem:[%s790_s8 + $0x28] sm:$0xff] %v455_v57 }

</bundles_post_ra>
